<compile_context>
chip_gen: v6e
topology: v6e:2x2x1
jax: 0.10.0
libtpu: 0.0.40
codegen_flags: <defaults>
</compile_context>

<pallas_src>
import functools

import numpy as np
import jax
import jax.numpy as jnp
from jax.experimental import pallas as pl
from jax.experimental.pallas import tpu as pltpu


# ----------------------------------------------------------------------------
# Fused kernel: 2x2 patch gather + LayerNorm(4C) + Linear(4C -> 2C, no bias).
# ----------------------------------------------------------------------------
def _patch_merging_kernel(x_ref, gamma_ref, beta_ref, w_ref, o_ref, *, eps):
    # x_ref : (1, Hh, 2, Wh, 2C)  -- axis 2 is the h-parity, lanes hold
    #                                [w-even channels | w-odd channels]
    # gamma_ref, beta_ref : (1, 4C)   (already permuted to kernel channel order)
    # w_ref : (4C, 2C)                (rows permuted to kernel channel order)
    # o_ref : (1, Hh*Wh, 2C)
    Hh = x_ref.shape[1]
    Wh = x_ref.shape[3]
    C2 = x_ref.shape[4]            # = 2*C
    M = Hh * Wh

    # Strided VMEM loads (static indices, no HBM traffic): even-h and odd-h rows.
    xe = x_ref[0, :, 0, :, :].reshape(M, C2)   # [x0 | x2] halves
    xo = x_ref[0, :, 1, :, :].reshape(M, C2)   # [x1 | x3] halves

    # Full 4C feature per merged patch; kernel channel order = [x0, x2, x1, x3].
    x4 = jnp.concatenate([xe, xo], axis=-1).astype(jnp.float32)       # (M, 4C)

    # LayerNorm over the 4C axis (biased variance, eps inside sqrt -> PyTorch).
    mu = jnp.mean(x4, axis=-1, keepdims=True)
    xc = x4 - mu
    var = jnp.mean(xc * xc, axis=-1, keepdims=True)
    xn = xc * jax.lax.rsqrt(var + eps)
    y = xn * gamma_ref[...] + beta_ref[...]                           # (M, 4C)

    # Single big-K MXU matmul (K = 4C), f32 accumulation.
    out = jnp.dot(y, w_ref[...], preferred_element_type=jnp.float32)  # (M, 2C)
    o_ref[0] = out.astype(o_ref.dtype)


def patch_merging(x, gamma, beta, w_reduction, input_resolution, eps=1e-5):
    """Fused PatchMerging forward.

    x            : (B, H*W, C)
    gamma, beta  : (4C,)  LayerNorm affine params (PyTorch channel order)
    w_reduction  : (4C, 2C)  reduction weight, math form y_norm @ W
    returns      : (B, (H//2)*(W//2), 2C)
    """
    H, W = input_resolution
    B, L, C = x.shape
    assert L == H * W, "input feature has wrong size"
    assert H % 2 == 0 and W % 2 == 0, f"x size ({H}*{W}) are not even."
    Hh, Wh = H // 2, W // 2
    M = Hh * Wh

    # Zero-cost contiguous view: (B, Hh, h-parity, Wh, 2C).
    xv = x.reshape(B, Hh, 2, Wh, 2 * C)

    # Kernel channel order is [x0, x2, x1, x3]; PyTorch order is [x0, x1, x2, x3].
    # Permute the per-channel params once so the kernel needs no re-shuffle.
    perm = np.concatenate([np.arange(0, C), np.arange(2 * C, 3 * C),
                           np.arange(C, 2 * C), np.arange(3 * C, 4 * C)])
    gamma_k = gamma[perm].reshape(1, 4 * C)
    beta_k = beta[perm].reshape(1, 4 * C)
    w_k = w_reduction[perm, :]

    kernel = functools.partial(_patch_merging_kernel, eps=eps)
    return pl.pallas_call(
        kernel,
        out_shape=jax.ShapeDtypeStruct((B, M, 2 * C), x.dtype),
        grid=(B,),
        in_specs=[
            pl.BlockSpec((1, Hh, 2, Wh, 2 * C), lambda b: (b, 0, 0, 0, 0)),
            pl.BlockSpec((1, 4 * C), lambda b: (0, 0)),
            pl.BlockSpec((1, 4 * C), lambda b: (0, 0)),
            pl.BlockSpec((4 * C, 2 * C), lambda b: (0, 0)),
        ],
        out_specs=pl.BlockSpec((1, M, 2 * C), lambda b: (b, 0, 0)),
        compiler_params=pltpu.CompilerParams(
            dimension_semantics=("parallel",)),
    )(xv, gamma_k, beta_k, w_k)


# ----------------------------------------------------------------------------
# Pure-JAX reference mirroring the PyTorch module (for correctness check).
# ----------------------------------------------------------------------------
def patch_merging_ref(x, gamma, beta, w_reduction, input_resolution, eps=1e-5):
    H, W = input_resolution
    B, L, C = x.shape
    xr = x.reshape(B, H, W, C)
    x0 = xr[:, 0::2, 0::2, :]
    x1 = xr[:, 1::2, 0::2, :]
    x2 = xr[:, 0::2, 1::2, :]
    x3 = xr[:, 1::2, 1::2, :]
    xc = jnp.concatenate([x0, x1, x2, x3], axis=-1).reshape(B, -1, 4 * C)
    mu = jnp.mean(xc, axis=-1, keepdims=True)
    var = jnp.mean((xc - mu) ** 2, axis=-1, keepdims=True)
    xn = (xc - mu) / jnp.sqrt(var + eps)
    y = xn * gamma + beta
    return jnp.dot(y, w_reduction, precision=jax.lax.Precision.HIGHEST)


if __name__ == "__main__":
    key = jax.random.PRNGKey(0)
    kx, kg, kb, kw = jax.random.split(key, 4)

    # Small Swin-style shapes: batch=2, resolution 16x16, dim=64
    # -> input (2, 256, 64), output (2, 64, 128) (lane-dense 2C = 128).
    B, H, W, C = 2, 16, 16, 64
    x = jax.random.normal(kx, (B, H * W, C), jnp.float32)
    gamma = 1.0 + 0.1 * jax.random.normal(kg, (4 * C,), jnp.float32)
    beta = 0.1 * jax.random.normal(kb, (4 * C,), jnp.float32)
    w_reduction = 0.02 * jax.random.normal(kw, (4 * C, 2 * C), jnp.float32)

    out = patch_merging(x, gamma, beta, w_reduction, (H, W))
    jax.block_until_ready(out)
    assert out.shape == (B, (H // 2) * (W // 2), 2 * C), out.shape

    ref = patch_merging_ref(x, gamma, beta, w_reduction, (H, W))
    err = float(jnp.max(jnp.abs(out - ref)))
    assert err < 2e-2, f"max abs err {err}"

    print("KERNEL_OK")
</pallas_src>

<mosaic_0001>
module attributes {stable_mosaic.version = 11 : i64} {
  func.func @_patch_merging_kernel(%arg0: i32, %arg1: memref<1x8x2x8x128xf32, #tpu.memory_space<vmem>>, %arg2: memref<1x256xf32, #tpu.memory_space<vmem>>, %arg3: memref<1x256xf32, #tpu.memory_space<vmem>>, %arg4: memref<256x128xf32, #tpu.memory_space<vmem>>, %arg5: memref<1x64x128xf32, #tpu.memory_space<vmem>>) attributes {dimension_semantics = [#tpu.dimension_semantics<parallel>], iteration_bounds = array<i64: 2>, scalar_prefetch = 0 : i64, scratch_operands = 0 : i64, tpu.core_type = #tpu.core_type<tc>, window_params = [{transform_indices = @transform_0, window_bounds = array<i64: 1, 8, 2, 8, 128>}, {pipeline_mode = #tpu.pipeline_mode<synchronous>, transform_indices = @transform_1, window_bounds = array<i64: 1, 256>}, {pipeline_mode = #tpu.pipeline_mode<synchronous>, transform_indices = @transform_2, window_bounds = array<i64: 1, 256>}, {pipeline_mode = #tpu.pipeline_mode<synchronous>, transform_indices = @transform_3, window_bounds = array<i64: 256, 128>}, {transform_indices = @transform_4, window_bounds = array<i64: 1, 64, 128>}]} {
    %c0 = arith.constant 0 : index
    %c0_0 = arith.constant 0 : index
    %c0_1 = arith.constant 0 : index
    %c0_2 = arith.constant 0 : index
    %c0_3 = arith.constant 0 : index
    %0 = vector.load %arg1[%c0, %c0_0, %c0_1, %c0_2, %c0_3] : memref<1x8x2x8x128xf32, #tpu.memory_space<vmem>>, vector<1x8x1x8x128xf32>
    %1 = vector.shape_cast %0 : vector<1x8x1x8x128xf32> to vector<8x8x128xf32>
    %2 = vector.shape_cast %1 : vector<8x8x128xf32> to vector<64x128xf32>
    %c0_4 = arith.constant 0 : index
    %c0_5 = arith.constant 0 : index
    %c1 = arith.constant 1 : index
    %c0_6 = arith.constant 0 : index
    %c0_7 = arith.constant 0 : index
    %3 = vector.load %arg1[%c0_4, %c0_5, %c1, %c0_6, %c0_7] : memref<1x8x2x8x128xf32, #tpu.memory_space<vmem>>, vector<1x8x1x8x128xf32>
    %4 = vector.shape_cast %3 : vector<1x8x1x8x128xf32> to vector<8x8x128xf32>
    %5 = vector.shape_cast %4 : vector<8x8x128xf32> to vector<64x128xf32>
    %6 = tpu.concatenate %2, %5 in 1 : vector<64x128xf32>, vector<64x128xf32> -> vector<64x256xf32>
    %cst = arith.constant dense<0.000000e+00> : vector<64xf32>
    %7 = vector.multi_reduction <add>, %6, %cst [1] : vector<64x256xf32> to vector<64xf32>
    %8 = vector.shape_cast %7 : vector<64xf32> to vector<64x1xf32>
    %cst_8 = arith.constant 2.560000e+02 : f32
    %9 = vector.broadcast %cst_8 : f32 to vector<64x1xf32>
    %10 = arith.divf %8, %9 : vector<64x1xf32>
    %11 = vector.broadcast %10 : vector<64x1xf32> to vector<64x256xf32>
    %12 = arith.subf %6, %11 : vector<64x256xf32>
    %13 = arith.mulf %12, %12 : vector<64x256xf32>
    %cst_9 = arith.constant dense<0.000000e+00> : vector<64xf32>
    %14 = vector.multi_reduction <add>, %13, %cst_9 [1] : vector<64x256xf32> to vector<64xf32>
    %15 = vector.shape_cast %14 : vector<64xf32> to vector<64x1xf32>
    %cst_10 = arith.constant 2.560000e+02 : f32
    %16 = vector.broadcast %cst_10 : f32 to vector<64x1xf32>
    %17 = arith.divf %15, %16 : vector<64x1xf32>
    %cst_11 = arith.constant 9.99999974E-6 : f32
    %18 = vector.broadcast %cst_11 : f32 to vector<64x1xf32>
    %19 = arith.addf %17, %18 : vector<64x1xf32>
    %20 = math.rsqrt %19 : vector<64x1xf32>
    %21 = vector.broadcast %20 : vector<64x1xf32> to vector<64x256xf32>
    %22 = arith.mulf %12, %21 : vector<64x256xf32>
    %c0_12 = arith.constant 0 : index
    %c0_13 = arith.constant 0 : index
    %23 = vector.load %arg2[%c0_12, %c0_13] : memref<1x256xf32, #tpu.memory_space<vmem>>, vector<1x256xf32>
    %24 = vector.broadcast %23 : vector<1x256xf32> to vector<64x256xf32>
    %25 = arith.mulf %22, %24 : vector<64x256xf32>
    %c0_14 = arith.constant 0 : index
    %c0_15 = arith.constant 0 : index
    %26 = vector.load %arg3[%c0_14, %c0_15] : memref<1x256xf32, #tpu.memory_space<vmem>>, vector<1x256xf32>
    %27 = vector.broadcast %26 : vector<1x256xf32> to vector<64x256xf32>
    %28 = arith.addf %25, %27 : vector<64x256xf32>
    %c0_16 = arith.constant 0 : index
    %c0_17 = arith.constant 0 : index
    %29 = vector.load %arg4[%c0_16, %c0_17] : memref<256x128xf32, #tpu.memory_space<vmem>>, vector<256x128xf32>
    %cst_18 = arith.constant dense<0.000000e+00> : vector<64x128xf32>
    %30 = tpu.matmul %28, %29, %cst_18 {dimension_numbers = #tpu.dot_dimension_numbers<[1], [0], [0], [1], [0, 0, 1, 1], [], []>} : vector<64x256xf32>, vector<256x128xf32>, vector<64x128xf32> -> vector<64x128xf32>
    %c0_19 = arith.constant 0 : index
    %c0_20 = arith.constant 0 : index
    %c0_21 = arith.constant 0 : index
    %31 = vector.load %arg5[%c0_19, %c0_20, %c0_21] : memref<1x64x128xf32, #tpu.memory_space<vmem>>, vector<1x64x128xf32>
    %32 = vector.shape_cast %31 : vector<1x64x128xf32> to vector<64x128xf32>
    %33 = vector.shape_cast %30 : vector<64x128xf32> to vector<1x64x128xf32>
    tpu.vector_store %arg5[%c0_19, %c0_20, %c0_21], %33 {strides = array<i32>} : memref<1x64x128xf32, #tpu.memory_space<vmem>>, vector<1x64x128xf32>,
    return
  }
  func.func @transform_0(%arg0: i32) -> (i32, i32, i32, i32, i32) {
    %c0_i32 = arith.constant 0 : i32
    %c0_i32_0 = arith.constant 0 : i32
    %c0_i32_1 = arith.constant 0 : i32
    %c0_i32_2 = arith.constant 0 : i32
    %c0_i32_3 = arith.constant 0 : i32
    return %arg0, %c0_i32, %c0_i32_0, %c0_i32_1, %c0_i32_2 : i32, i32, i32, i32, i32
  }
  func.func @transform_1(%arg0: i32) -> (i32, i32) {
    %c0_i32 = arith.constant 0 : i32
    %c0_i32_0 = arith.constant 0 : i32
    %c0_i32_1 = arith.constant 0 : i32
    return %c0_i32, %c0_i32_0 : i32, i32
  }
  func.func @transform_2(%arg0: i32) -> (i32, i32) {
    %c0_i32 = arith.constant 0 : i32
    %c0_i32_0 = arith.constant 0 : i32
    %c0_i32_1 = arith.constant 0 : i32
    return %c0_i32, %c0_i32_0 : i32, i32
  }
  func.func @transform_3(%arg0: i32) -> (i32, i32) {
    %c0_i32 = arith.constant 0 : i32
    %c0_i32_0 = arith.constant 0 : i32
    %c0_i32_1 = arith.constant 0 : i32
    return %c0_i32, %c0_i32_0 : i32, i32
  }
  func.func @transform_4(%arg0: i32) -> (i32, i32, i32) {
    %c0_i32 = arith.constant 0 : i32
    %c0_i32_0 = arith.constant 0 : i32
    %c0_i32_1 = arith.constant 0 : i32
    return %arg0, %c0_i32, %c0_i32_0 : i32, i32, i32
  }
}

</mosaic_0001>

<bundles_post_ra>
// kernel: tpu_custom_call.1
= control target key start
LH: loop header
LB: loop body
LE: loop exit
PB: predicated region body
PF: predicated region fallthrough
CT: control target
= control target key end

     0   :  { %s1463_s0 = inlined_call_operand.hbm [shape: f32[2,8,2,8,128], index: 0, kind: input, shape index: {}]   ;;  %s1464_s1 = inlined_call_operand.hbm [shape: f32[1,256], index: 1, kind: input, shape index: {}]   ;;  %s1465_s2 = inlined_call_operand.vmem [shape: f32[1,256], index: 2, kind: input, shape index: {}]   ;;  %s1466_s3 = inlined_call_operand.hbm [shape: f32[256,128], index: 3, kind: input, shape index: {}]   ;;  %s1467_s4 = inlined_call_operand.hbm [shape: f32[2,64,128], index: 4, kind: output, shape index: {}]  }
   0x1   :  { %1472 = sst [smem:[#allocation12_spill]] %s1464_s1 }
   0x2   :  { %9 = vsyncpa [#allocation3], 0 }
   0x3   :  { %11 = vsyncpa [#allocation3 + $0x1], 0 }
   0x4   :  { %12 = vsyncpa [#allocation6], 0 }
   0x5   :  { %13 = vsyncpa [#allocation4], 0 }
   0x6   :  { %15 = vsyncpa [#allocation4 + $0x1], 0  ;;  %s1082_s15 = smov 0   ;;  %s1084_s16 = smov 0  }
   0x7   :  { %s1086_s17 = smov 0   ;;  %s1088_s18 = smov 0  }
   0x8 LB: > { %s1103_s19 = sadd.s32 4294967295, %s1047_s18   ;;  %s696_s20 = sadd.s32 4294967294, %s1047_s18   ;;  %s1047_s18 = sphi %s1088_s18, %s1492_s18   ;;  %s1043_s17 = sphi %s1086_s17, %s1491_s17   ;;  %s1039_s16 = sphi %s1084_s16, %s1490_s16   ;;  %s1035_s15 = sphi %s1082_s15, %s1489_s15  }
   0x9   : > { %s1107_s21 = sadd.s32 1, %s1047_s18   ;;  %s28_s22 = sadd.s32 1, %s1043_s17 }
   0xa   : > { %s25_s23 = ssub.s32 %s1047_s18, %s1107_s21  ;;  %p35_p0 = scmp.ne.s32.totalorder %s1043_s17, %s1039_s16 }
   0xb   : > { %p26_p1 = scmp.eq.s32.totalorder %s25_s23, 0  ;;  %p36_p2 = scmp.eq.s32.totalorder %s1047_s18, 0 }
   0xc   : > { %p41_p3 = scmp.ne.s32.totalorder %s1039_s16, %s1035_s15  ;;  %p1468_p4 = scmp.eq.s32.totalorder %s1103_s19, 0 }
   0xd   : > { %s1119_s24 = scalar_select %p26_p1, %s1043_s17, %s28_s22  }
   0xe   : > { %p1121_p5 = por %p36_p2, %p35_p0  ;;  %p1127_p6 = por %p1468_p4, %p41_p3 }
   0xf   : > { %p128_p7 = scmp.eq.s32.totalorder %s1103_s19, 1  ;;  %p134_p8 = scmp.eq.s32.totalorder %s696_s20, 1 }
  0x10   : > { %s1474_s26 = scalar_select %p1127_p6, 1, 0 }
  0x11   : > { %p697_p9 = scmp.ge.s32.totalorder %s1047_s18, 1  ;;  %p141_p10 = scmp.lt.s32.totalorder %s1047_s18, 3 }
  0x12   : > { %p1134_p11 = por %p128_p7, %p35_p0  ;;  %p1138_p12 = por %p134_p8, %p41_p3 }
  0x13   : > { %p1142_p13 = pnand %p697_p9, %p141_p10  ;;  %s1049_s30 = smov [#allocation5]  }
  0x14   : > { %s1475_s27 = scalar_select %p1134_p11, 1, 0 }
  0x15   : > { %s1476_s28 = scalar_select %p1138_p12, 1, 0 }
  0x16   : > { %s1477_s29 = scalar_select %p1142_p13, 1, 0 }
  0x17   : > { %p824_p2 = pneg %p1142_p13  ;;  %s154_s5 = sshll.u32 %s1049_s30, 4  ;;  %s155_s5 = int_to_ptr.vmem [resolvable:$true] %s154_s5 }
  0x18   : > { %p841_p4 = scmp.lt.s32.totalorder %s1047_s18, 2  ;;  %p1478_p0 = scmp.eq.s32.totalorder %s1103_s19, 0 }
  0x19   : > { %s1050_s8 = smov [#allocation7]   ;;  %s910_s10 = scalar_lea.vmem %s155_s5, 32 }
  0x1a   : > { %p1152_p7 = pnand %p824_p2, %p1478_p0  ;;  %p1158_p3 = pnand %p841_p4, %p1121_p5 }
  0x1b   : > { %s167_s9 = sshll.u32 %s1050_s8, 4  ;;  %p911_p9 = scmp.ne.s32.totalorder %s155_s5, %s910_s10  ;;  %s168_s9 = int_to_ptr.vmem [resolvable:$true] %s167_s9 }
  0x1c   : > { %p901_p8 = pneg %p1152_p7  ;;  %p918_p0 = scmp.lt.s32.totalorder %s155_s5, %s155_s5 }
  0x1d   : > { %p919_p1 = scmp.lt.s32.totalorder %s910_s10, %s910_s10 }
  0x1e   : > { %p913_p10 = pnand %p911_p9, %p901_p8 }
  0x1f   : > { %p920_p12 = por %p919_p1, %p918_p0 }
  0x20   : > { %p914_p2 = pneg %p913_p10 }
  0x22   : > { %p921_p11 = pnand %p920_p12, %p914_p2 }
  0x24   : > { %924 = shalt.err (!%p921_p11)
}
  0x25   : > { %s1481_s1 = sld [smem:[#allocation12_spill]]  ;;  %s181_s13 = sand.u32 1, %s1043_s17  }
  0x26   : > { %s936_s14 = scalar_lea.vmem %s168_s9, 4096  ;;  %p944_p10 = scmp.lt.s32.totalorder %s168_s9, %s168_s9 }
  0x27   : > { %p937_p4 = scmp.ne.s32.totalorder %s168_s9, %s936_s14  ;;  %p945_p6 = scmp.lt.s32.totalorder %s936_s14, %s936_s14 }
  0x29   : > { %p939_p5 = pnand %p937_p4, %p901_p8  ;;  %p946_p1 = por %p945_p6, %p944_p10 }
  0x2b   : > { %827 = dma.hbm_to_vmem [thread:$0]  (!%p1152_p7), %s1481_s1, 32, %s155_s5, [#allocation6]  }
  0x2c   : > { %p940_p9 = pneg %p939_p5 }
  0x2e   : > { %p947_p12 = pnand %p946_p1, %p940_p9 }
  0x30   : > { %950 = shalt.err (!%p947_p12)
}
  0x31   : > { %s1051_s20 = smov 128   ;;  %s1052_s22 = smov 8  }
  0x32   : > { %830 = dma.hbm_to_vmem [thread:$0]  (!%p1152_p7), %s1466_s3, 4096, %s168_s9, [#allocation6], %s1051_s20, %s1051_s20, %s1052_s22  }
  0x33   : > { %s701_s30 = sshll.u32 %s181_s13, 7  ;;  %s722_s5 = sshll.u32 %s1047_s18, 11 }
  0x34   : > { %s1188_s11 = scalar_lea.hbm %s1463_s0, %s722_s5  ;;  %s185_s12 = scalar_lea.vmem [#allocation2], %s701_s30 }
  0x35   : > { %s192_s14 = sshll.u32 %s185_s12, 4  ;;  %s1192_s6 = scalar_lea.sflag [#allocation3], %s181_s13  ;;  %s1190_s14 = int_to_ptr.vmem [resolvable:$true] %s192_s14 }
  0x36   : > { %s951_s1 = scalar_lea.hbm %s1188_s11, 2048  ;;  %p953_p11 = pneg %p1158_p3 }
  0x37   : > { %p952_p6 = scmp.ne.s32.totalorder %s1188_s11, %s951_s1  ;;  %s956_s25 = scalar_lea.hbm %s1463_s0, 4096 }
  0x38   : > { %p957_p2 = scmp.lt.s32.totalorder %s1188_s11, %s1463_s0  ;;  %p958_p0 = scmp.lt.s32.totalorder %s956_s25, %s951_s1 }
  0x39   : > { %p954_p7 = pnand %p953_p11, %p952_p6 }
  0x3a   : > { %p959_p4 = por %p958_p0, %p957_p2 }
  0x3b   : > { %p955_p8 = pneg %p954_p7 }
  0x3d   : > { %p960_p5 = pnand %p959_p4, %p955_p8 }
  0x3f   : > { %963 = shalt.err (!%p960_p5)
}
  0x40   : > { %s964_s13 = scalar_lea.vmem %s1190_s14, 2048  ;;  %s1053_s30 = smov [#allocation2]  }
  0x41   : > { %p965_p9 = scmp.ne.s32.totalorder %s1190_s14, %s964_s13  ;;  %s969_s10 = sshll.u32 %s1053_s30, 4  ;;  %s970_s10 = int_to_ptr.vmem [resolvable:$false] %s969_s10 }
  0x42   : > { %s971_s12 = scalar_lea.vmem %s970_s10, 4096  ;;  %p972_p12 = scmp.lt.s32.totalorder %s1190_s14, %s970_s10 }
  0x43   : > { %p967_p10 = pnand %p965_p9, %p953_p11  ;;  %p973_p6 = scmp.lt.s32.totalorder %s971_s12, %s964_s13 }
  0x45   : > { %p968_p1 = pneg %p967_p10  ;;  %p974_p7 = por %p973_p6, %p972_p12 }
  0x47   : > { %p975_p13 = pnand %p974_p7, %p968_p1 }
  0x49   : > { %978 = shalt.err (!%p975_p13)
}
  0x4a   : > { %834 = dma.hbm_to_vmem [thread:$0]  (!%p1158_p3), %s1188_s11, 2048, %s1190_s14, %s1192_s6, %s1051_s20, %s1051_s20, %s1052_s22  }
  0x4b   : > { %p1482_p11 = scmp.ne.s32.totalorder %s1477_s29, 0 }
  0x4c   : > { %s1219_s1 = sand.u32 (!%p1482_p11), 1, %s1039_s16   ;;  %p1483_p13 = scmp.ne.s32.totalorder (!%p1482_p11), %s1474_s26, 0 }
  0x4d   : > { %204 = sbr.rel (%p1482_p11) target bundleno = 625 (0x271), region = 36  ;;  %s705_s9 = sshll.u32 (!%p1482_p11), %s1219_s1, 7 }
  0x4e   : > { %s207_s23 = scalar_lea.sflag (!%p1482_p11), [#allocation3], %s1219_s1  ;;  %s210_s25 = scalar_lea.vmem (!%p1482_p11), [#allocation2], %s705_s9 }
  0x52   : > { %1022 = dma.done.wait (%p1483_p13), %s207_s23, 2048  }
  0x53   : > { %1024 = vsyncadd (%p1483_p13), %s207_s23, 4294965248  ;;  %p1484_p8 = scmp.eq.s32.totalorder %s1103_s19, 0 }
  0x55   : > { %1026 = dma.done.wait (%p1484_p8), [#allocation6], 4128   ;;  %p1485_p3 = pmov %p1484_p8 }
  0x56   : > { %v243_v0 = vld [vmem:[%s210_s25] sm:$0xff]  ;;  %v709_v1 = vld [vmem:[%s210_s25 + $0x8] sm:$0xff]  ;;  %v244_v2 = vld [vmem:[%s210_s25 + $0x10] sm:$0xff]  ;;  %s708_s7 = sshll.u32 %s1219_s1, 6  ;;  %s723_s11 = sshll.u32 %s1103_s19, 10 }
  0x57   : > { %1028 = vsyncadd (%p1485_p3), [#allocation6], 4294963168  ;;  %v260_v3 = vadd.f32 %v709_v1, %v243_v0  ;;  %v710_v4 = vld [vmem:[%s210_s25 + $0x18] sm:$0xff]  ;;  %v1231_v5 = vld [vmem:[%s210_s25 + $0x40] sm:$0xff]  ;;  %s1403_s20 = scalar_lea.vmem [#allocation8], %s708_s7  ;;  %s1419_s5 = scalar_lea.hbm %s1467_s4, %s723_s11 }
  0x58   : > { %v1233_v6 = vld [vmem:[%s210_s25 + $0x48] sm:$0xff]  ;;  %v263_v7 = vadd.f32 %v710_v4, %v244_v2  ;;  %v1235_v8 = vld [vmem:[%s210_s25 + $0x50] sm:$0xff]  ;;  %v1237_v9 = vld [vmem:[%s210_s25 + $0x58] sm:$0xff]  ;;  %s604_s22 = sshll.u32 %s1403_s20, 4  ;;  %s591_s8 = scalar_lea.sflag [#allocation4], %s1219_s1  ;;  %s1412_s22 = int_to_ptr.vmem [resolvable:$true] %s604_s22 }
  0x59   : > { %261 = vadd.xlane.f32.xlu0 %v260_v3  ;;  %v272_v10 = vadd.f32 %v1233_v6, %v1231_v5  ;;  %v275_v11 = vadd.f32 %v1237_v9, %v1235_v8  ;;  %v1243_v12 = vld [vmem:[%s210_s25 + $0x20] sm:$0xff]  ;;  %v1245_v13 = vld [vmem:[%s210_s25 + $0x28] sm:$0xff]  ;;  %v1255_v18 = vld [vmem:[%s210_s25 + $0x30] sm:$0xff]  ;;  %s979_s13 = scalar_lea.vmem %s1412_s22, 1024  ;;  %p1486_p0 = scmp.ne.s32.totalorder %s1475_s27, 0 }
  0x5a   : > { %264 = vadd.xlane.f32.xlu1 %v263_v7  ;;  %v1247_v14 = vld [vmem:[%s210_s25 + $0x60] sm:$0xff]  ;;  %v1249_v15 = vld [vmem:[%s210_s25 + $0x68] sm:$0xff]  ;;  %v266_v16 = vadd.f32 %v1245_v13, %v1243_v12  ;;  %v1257_v19 = vld [vmem:[%s210_s25 + $0x38] sm:$0xff]  ;;  %p980_p2 = scmp.ne.s32.totalorder %s1412_s22, %s979_s13  ;;  %s1054_s19 = smov [#allocation8]  }
  0x5b   : > { %v278_v17 = vadd.f32 %v1249_v15, %v1247_v14  ;;  %v1259_v20 = vld [vmem:[%s210_s25 + $0x70] sm:$0xff]  ;;  %v1261_v21 = vld [vmem:[%s210_s25 + $0x78] sm:$0xff]  ;;  %v269_v22 = vadd.f32 %v1257_v19, %v1255_v18  ;;  %v473_v30 = vld [vmem:[#allocation7 + $0xe0] sm:$0xff]  ;;  %s983_s30 = sshll.u32 %s1054_s19, 4  ;;  %s984_s30 = int_to_ptr.vmem [resolvable:$false] %s983_s30 }
  0x5c   : > { %v281_v23 = vadd.f32 %v1261_v21, %v1259_v20  ;;  %v476_v24 = vld [vmem:[#allocation7 + $0xf8] sm:$0xff]  ;;  %v475_v26 = vld [vmem:[#allocation7 + $0xf0] sm:$0xff]  ;;  %v474_v28 = vld [vmem:[#allocation7 + $0xe8] sm:$0xff]  ;;  %p981_p4 = pnand %p980_p2, %p1486_p0  ;;  %s985_s10 = scalar_lea.vmem %s984_s30, 2048 }
  0x5d   : > { %273 = vadd.xlane.f32.xlu0 %v272_v10  ;;  %v460_v25 = vld [vmem:[#allocation7 + $0x78] sm:$0xff]  ;;  %724 = vmatprep.subr.mxu0 %v476_v24  ;;  %v459_v27 = vld [vmem:[#allocation7 + $0x70] sm:$0xff]  ;;  %v458_v29 = vld [vmem:[#allocation7 + $0x68] sm:$0xff]  ;;  %p986_p9 = scmp.lt.s32.totalorder %s1412_s22, %s984_s30  ;;  %p987_p10 = scmp.lt.s32.totalorder %s985_s10, %s979_s13 }
  0x5e   : > { %276 = vadd.xlane.f32.xlu1 %v275_v11  ;;  %780 = vmatprep.subr.mxu1 %v476_v24  ;;  %v456_v24 = vld [vmem:[#allocation7 + $0x58] sm:$0xff]  ;;  %p982_p5 = pneg %p981_p4 }
  0x5f   : > { %725 = vmatpush3.msra.mxu0 %v460_v25  ;;  %796 = vmatpush3.msra.mxu1 %v460_v25  ;;  %p988_p1 = por %p987_p10, %p986_p9 }
  0x60   : > { %726 = vmatprep.subr.mxu0 %v475_v26  ;;  %781 = vmatprep.subr.mxu1 %v475_v26  ;;  %v471_v26 = vld [vmem:[#allocation7 + $0xd0] sm:$0xff] }
  0x61   : > { %267 = vadd.xlane.f32.xlu0 %v266_v16  ;;  %727 = vmatpush3.msra.mxu0 %v459_v27  ;;  %p989_p12 = pnand %p988_p1, %p982_p5 }
  0x62   : > { %279 = vadd.xlane.f32.xlu1 %v278_v17  ;;  %797 = vmatpush3.msra.mxu1 %v459_v27  ;;  %v455_v27 = vld [vmem:[#allocation7 + $0x50] sm:$0xff] }
  0x63   : > { %728 = vmatprep.subr.mxu0 %v474_v28  ;;  %782 = vmatprep.subr.mxu1 %v474_v28  ;;  %v470_v28 = vld [vmem:[#allocation7 + $0xc8] sm:$0xff] }
  0x64   : > { %729 = vmatpush3.msra.mxu0 %v458_v29  ;;  %798 = vmatpush3.msra.mxu1 %v458_v29  ;;  %v454_v29 = vld [vmem:[#allocation7 + $0x48] sm:$0xff] }
  0x65   : > { %270 = vadd.xlane.f32.xlu0 %v269_v22  ;;  %730 = vmatprep.subr.mxu0 %v473_v30 }
  0x66   : > { %282 = vadd.xlane.f32.xlu1 %v281_v23  ;;  %783 = vmatprep.subr.mxu1 %v473_v30  ;;  %v469_v30 = vld [vmem:[#allocation7 + $0xc0] sm:$0xff] }
  0xe2   : > { %v262_v31 = vpop.xlane.xlu0 %261 }
  0xe3   : > { %v285_v32 = vmul.f32 0.00390625, %v262_v31  ;;  %v265_v33 = vpop.xlane.xlu1 %264  ;;  %v453_v31 = vld [vmem:[#allocation7 + $0x40] sm:$0xff] }
  0xe4   : > { %v286_v34 = vmul.f32 0.00390625, %v265_v33  ;;  %v452_v33 = vld [vmem:[#allocation7 + $0x38] sm:$0xff] }
  0xe5   : > { %v1267_v35 = vsub.f32 %v243_v0, %v285_v32  ;;  %v1269_v36 = vsub.f32 %v709_v1, %v285_v32  ;;  %v468_v32 = vld [vmem:[#allocation7 + $0xb8] sm:$0xff] }
  0xe6   : > { %v1271_v37 = vsub.f32 %v244_v2, %v286_v34  ;;  %v1273_v38 = vsub.f32 %v710_v4, %v286_v34  ;;  %v274_v39 = vpop.xlane.xlu0 %273  ;;  %v467_v34 = vld [vmem:[#allocation7 + $0xb0] sm:$0xff] }
  0xe7   : > { %v289_v40 = vmul.f32 0.00390625, %v274_v39  ;;  %v277_v41 = vpop.xlane.xlu1 %276  ;;  %v309_v42 = vmul.f32 %v1267_v35, %v1267_v35  ;;  %v310_v43 = vmul.f32 %v1269_v36, %v1269_v36  ;;  %v451_v39 = vld [vmem:[#allocation7 + $0x30] sm:$0xff] }
  0xe8   : > { %v290_v44 = vmul.f32 0.00390625, %v277_v41  ;;  %v311_v45 = vmul.f32 %v1271_v37, %v1271_v37  ;;  %v312_v46 = vmul.f32 %v1273_v38, %v1273_v38  ;;  %v450_v41 = vld [vmem:[#allocation7 + $0x28] sm:$0xff] }
  0xe9   : > { %v1284_v47 = vsub.f32 %v1231_v5, %v289_v40  ;;  %v1287_v48 = vsub.f32 %v1233_v6, %v289_v40  ;;  %v325_v49 = vadd.f32 %v310_v43, %v309_v42  ;;  %v466_v40 = vld [vmem:[#allocation7 + $0xa8] sm:$0xff]  ;;  %v465_v42 = vld [vmem:[#allocation7 + $0xa0] sm:$0xff] }
  0xea   : > { %v1290_v50 = vsub.f32 %v1235_v8, %v290_v44  ;;  %v1293_v51 = vsub.f32 %v1237_v9, %v290_v44  ;;  %v268_v52 = vpop.xlane.xlu0 %267  ;;  %v328_v55 = vadd.f32 %v312_v46, %v311_v45  ;;  %v449_v43 = vld [vmem:[#allocation7 + $0x20] sm:$0xff]  ;;  %v464_v44 = vld [vmem:[#allocation7 + $0x98] sm:$0xff]  ;;  %v463_v46 = vld [vmem:[#allocation7 + $0x90] sm:$0xff] }
  0xeb   : > { %v287_v53 = vmul.f32 0.00390625, %v268_v52  ;;  %326 = vadd.xlane.f32.xlu0 %v325_v49  ;;  %v280_v54 = vpop.xlane.xlu1 %279  ;;  %v317_v56 = vmul.f32 %v1284_v47, %v1284_v47  ;;  %v318_v57 = vmul.f32 %v1287_v48, %v1287_v48  ;;  %v448_v45 = vld [vmem:[#allocation7 + $0x18] sm:$0xff]  ;;  %v447_v49 = vld [vmem:[#allocation7 + $0x10] sm:$0xff]  ;;  %v462_v52 = vld [vmem:[#allocation7 + $0x88] sm:$0xff] }
  0xec   : > { %v291_v58 = vmul.f32 0.00390625, %v280_v54  ;;  %v319_v59 = vmul.f32 %v1290_v50, %v1290_v50  ;;  %v320_v60 = vmul.f32 %v1293_v51, %v1293_v51  ;;  %v461_v54 = vld [vmem:[#allocation7 + $0x80] sm:$0xff] }
  0xed   : > { %v1304_v61 = vsub.f32 %v1243_v12, %v287_v53  ;;  %v1307_v62 = vsub.f32 %v1245_v13, %v287_v53  ;;  %v337_v63 = vadd.f32 %v318_v57, %v317_v56  ;;  %v446_v53 = vld [vmem:[#allocation7 + $0x8] sm:$0xff] }
  0xee   : > { %v1310_v0 = vsub.f32 %v1247_v14, %v291_v58  ;;  %v1313_v1 = vsub.f32 %v1249_v15, %v291_v58  ;;  %v271_v2 = vpop.xlane.xlu0 %270  ;;  %v340_v5 = vadd.f32 %v320_v60, %v319_v59 }
  0xef   : > { %v288_v3 = vmul.f32 0.00390625, %v271_v2  ;;  %329 = vadd.xlane.f32.xlu0 %v328_v55  ;;  %338 = vadd.xlane.f32.xlu1 %v337_v63  ;;  %v283_v4 = vpop.xlane.xlu1 %282  ;;  %v313_v6 = vmul.f32 %v1304_v61, %v1304_v61  ;;  %v314_v7 = vmul.f32 %v1307_v62, %v1307_v62  ;;  %v445_v55 = vld [vmem:[#allocation7] sm:$0xff]  ;;  %v391_v63 = vlaneseq }
  0xf0   : > { %v292_v8 = vmul.f32 0.00390625, %v283_v4  ;;  %v321_v9 = vmul.f32 %v1310_v0, %v1310_v0  ;;  %v322_v10 = vmul.f32 %v1313_v1, %v1313_v1 }
  0xf1   : > { %v1324_v11 = vsub.f32 %v1255_v18, %v288_v3  ;;  %v1327_v12 = vsub.f32 %v1257_v19, %v288_v3  ;;  %v331_v13 = vadd.f32 %v314_v7, %v313_v6 }
  0xf2   : > { %v1330_v14 = vsub.f32 %v1259_v20, %v292_v8  ;;  %v1333_v15 = vsub.f32 %v1261_v21, %v292_v8  ;;  %v343_v16 = vadd.f32 %v322_v10, %v321_v9  ;;  %v457_v20 = vld [vmem:[#allocation7 + $0x60] sm:$0xff]  ;;  %v472_v21 = vld [vmem:[#allocation7 + $0xd8] sm:$0xff]  ;;  %v392_v8 = vshrl.u32 %v391_v63, 7 }
  0xf3   : > { %341 = vadd.xlane.f32.xlu1 %v340_v5  ;;  %332 = vadd.xlane.f32.xlu0 %v331_v13  ;;  %v315_v17 = vmul.f32 %v1324_v11, %v1324_v11  ;;  %v316_v18 = vmul.f32 %v1327_v12, %v1327_v12 }
  0xf4   : > { %v323_v19 = vmul.f32 %v1330_v14, %v1330_v14  ;;  %v324_v22 = vmul.f32 %v1333_v15, %v1333_v15  ;;  %731 = vmatpush3.msra.mxu0 %v457_v20  ;;  %799 = vmatpush3.msra.mxu1 %v457_v20 }
  0xf5   : > { %v334_v23 = vadd.f32 %v316_v18, %v315_v17  ;;  %732 = vmatprep.subr.mxu0 %v472_v21  ;;  %784 = vmatprep.subr.mxu1 %v472_v21  ;;  %v389_v21 = vld [vmem:[#allocation5] sm:$0x3] }
  0xf6   : > { %v346_v25 = vadd.f32 %v324_v22, %v323_v19  ;;  %733 = vmatpush3.msra.mxu0 %v456_v24  ;;  %800 = vmatpush3.msra.mxu1 %v456_v24  ;;  %v393_v19 = vsub.s32 0, %v392_v8 }
  0xf7   : > { %344 = vadd.xlane.f32.xlu1 %v343_v16  ;;  %335 = vadd.xlane.f32.xlu0 %v334_v23  ;;  %v397_v23 = vsub.s32 1, %v392_v8 }
  0xf8   : > { %734 = vmatprep.subr.mxu0 %v471_v26  ;;  %785 = vmatprep.subr.mxu1 %v471_v26  ;;  %v417_v26 = vld [vmem:[%s1465_s2] sm:$0x3] }
  0xf9   : > { %735 = vmatpush3.msra.mxu0 %v455_v27  ;;  %801 = vmatpush3.msra.mxu1 %v455_v27 }
  0xfa   : > { %736 = vmatprep.subr.mxu0 %v470_v28  ;;  %786 = vmatprep.subr.mxu1 %v470_v28 }
  0xfb   : > { %347 = vadd.xlane.f32.xlu1 %v346_v25  ;;  %737 = vmatpush3.msra.mxu0 %v454_v29 }
  0xfc   : > { %738 = vmatprep.subr.mxu0 %v469_v30  ;;  %802 = vmatpush3.msra.mxu1 %v454_v29  ;;  %v1346_v29 = vrot.slane %v389_v21, %v393_v19 }
  0xfd   : > { %739 = vmatpush3.msra.mxu0 %v453_v31  ;;  %787 = vmatprep.subr.mxu1 %v469_v30  ;;  %v1348_v30 = vrot.slane %v389_v21, %v397_v23 }
  0xfe   : > { %740 = vmatprep.subr.mxu0 %v468_v32  ;;  %803 = vmatpush3.msra.mxu1 %v453_v31 }
  0xff   : > { %741 = vmatpush3.msra.mxu0 %v452_v33  ;;  %788 = vmatprep.subr.mxu1 %v468_v32  ;;  %v1350_v32 = vrot.slane %v417_v26, %v393_v19 }
 0x100   : > { %742 = vmatprep.subr.mxu0 %v467_v34  ;;  %804 = vmatpush3.msra.mxu1 %v452_v33 }
 0x101   : > { %743 = vmatpush3.msra.mxu0 %v451_v39  ;;  %789 = vmatprep.subr.mxu1 %v467_v34 }
 0x102   : > { %744 = vmatprep.subr.mxu0 %v466_v40  ;;  %805 = vmatpush3.msra.mxu1 %v451_v39  ;;  %v1353_v39 = vrot.slane %v417_v26, %v397_v23 }
 0x103   : > { %745 = vmatpush3.msra.mxu0 %v450_v41  ;;  %790 = vmatprep.subr.mxu1 %v466_v40 }
 0x104   : > { %746 = vmatprep.subr.mxu0 %v465_v42  ;;  %806 = vmatpush3.msra.mxu1 %v450_v41 }
 0x105   : > { %747 = vmatpush3.msra.mxu0 %v449_v43  ;;  %791 = vmatprep.subr.mxu1 %v465_v42 }
 0x106   : > { %748 = vmatprep.subr.mxu0 %v464_v44  ;;  %807 = vmatpush3.msra.mxu1 %v449_v43 }
 0x107   : > { %749 = vmatpush3.msra.mxu0 %v448_v45  ;;  %792 = vmatprep.subr.mxu1 %v464_v44 }
 0x108   : > { %750 = vmatprep.subr.mxu0 %v463_v46  ;;  %808 = vmatpush3.msra.mxu1 %v448_v45 }
 0x109   : > { %751 = vmatpush3.msra.mxu0 %v447_v49  ;;  %793 = vmatprep.subr.mxu1 %v463_v46 }
 0x10a   : > { %752 = vmatprep.subr.mxu0 %v462_v52  ;;  %809 = vmatpush3.msra.mxu1 %v447_v49 }
 0x10b   : > { %753 = vmatpush3.msra.mxu0 %v446_v53  ;;  %794 = vmatprep.subr.mxu1 %v462_v52 }
 0x10c   : > { %754 = vmatprep.subr.mxu0 %v461_v54  ;;  %810 = vmatpush3.msra.mxu1 %v446_v53 }
 0x10d   : > { %755 = vmatpush3.msra.mxu0 %v445_v55  ;;  %795 = vmatprep.subr.mxu1 %v461_v54 }
 0x10e   : > { %811 = vmatpush3.msra.mxu1 %v445_v55 }
 0x174   : > { %v327_v56 = vpop.xlane.xlu0 %326 }
 0x175   : > { %v349_v57 = vmul.f32 0.00390625, %v327_v56 }
 0x177   : > { %v357_v58 = vadd.f32 1e-05, %v349_v57 }
 0x178   : > { %v339_v59 = vpop.xlane.xlu1 %338  ;;  %v330_v60 = vpop.xlane.xlu0 %329 }
 0x179   : > { %883 = vrsqrt.f32 %v357_v58  ;;  %v353_v2 = vmul.f32 0.00390625, %v339_v59  ;;  %v350_v3 = vmul.f32 0.00390625, %v330_v60 }
 0x17b   : > { %v361_v4 = vadd.f32 1e-05, %v353_v2  ;;  %v358_v5 = vadd.f32 1e-05, %v350_v3 }
 0x17c   : > { %v342_v6 = vpop.xlane.xlu1 %341  ;;  %v333_v7 = vpop.xlane.xlu0 %332 }
 0x17d   : > { %885 = vrsqrt.f32 %v361_v4  ;;  %v354_v9 = vmul.f32 0.00390625, %v342_v6  ;;  %v351_v10 = vmul.f32 0.00390625, %v333_v7 }
 0x17e   : > { %887 = vrsqrt.f32 %v358_v5 }
 0x17f   : > { %v362_v13 = vadd.f32 1e-05, %v354_v9  ;;  %v359_v16 = vadd.f32 1e-05, %v351_v10 }
 0x180   : > { %v345_v17 = vpop.xlane.xlu1 %344  ;;  %v336_v18 = vpop.xlane.xlu0 %335 }
 0x181   : > { %889 = vrsqrt.f32 %v362_v13  ;;  %v355_v22 = vmul.f32 0.00390625, %v345_v17  ;;  %v352_v20 = vmul.f32 0.00390625, %v336_v18 }
 0x182   : > { %891 = vrsqrt.f32 %v359_v16 }
 0x183   : > { %v363_v24 = vadd.f32 1e-05, %v355_v22  ;;  %v360_v25 = vadd.f32 1e-05, %v352_v20 }
 0x184   : > { %v348_v27 = vpop.xlane.xlu1 %347 }
 0x185   : > { %893 = vrsqrt.f32 %v363_v24  ;;  %v356_v28 = vmul.f32 0.00390625, %v348_v27 }
 0x186   : > { %v884_v31 = vpop.eup %883  ;;  %895 = vrsqrt.f32 %v360_v25 }
 0x187   : > { %v364_v33 = vadd.f32 1e-05, %v356_v28  ;;  %v374_v34 = vmul.f32 %v884_v31, %v1269_v36  ;;  %v373_v40 = vmul.f32 %v884_v31, %v1267_v35 }
 0x189   : > { %897 = vrsqrt.f32 %v364_v33  ;;  %v402_v41 = vmul.f32 %v1348_v30, %v374_v34  ;;  %v401_v42 = vmul.f32 %v1346_v29, %v373_v40 }
 0x18a   : > { %v886_v43 = vpop.eup %885 }
 0x18b   : > { %v888_v44 = vpop.eup %887  ;;  %v430_v45 = vadd.f32 %v1353_v39, %v402_v41  ;;  %v429_v46 = vadd.f32 %v1350_v32, %v401_v42  ;;  %v382_v49 = vmul.f32 %v886_v43, %v1287_v48  ;;  %v381_v52 = vmul.f32 %v886_v43, %v1284_v47 }
 0x18c   : > { %v376_v36 = vmul.f32 %v888_v44, %v1273_v38  ;;  %v375_v53 = vmul.f32 %v888_v44, %v1271_v37 }
 0x18d   : > { %541 = vmatprep.mubr.f32.mxu0 %v430_v45  ;;  %v410_v35 = vmul.f32 %v1348_v30, %v382_v49  ;;  %v409_v54 = vmul.f32 %v1346_v29, %v381_v52 }
 0x18e   : > { %v890_v55 = vpop.eup %889  ;;  %542 = vmatmul.mubr.f32.vlgmr.msra.gmra.mxu0 %v429_v46  ;;  %v404_v56 = vmul.f32 %v1348_v30, %v376_v36  ;;  %v403_v57 = vmul.f32 %v1346_v29, %v375_v53 }
 0x18f   : > { %v892_v58 = vpop.eup %891  ;;  %v438_v48 = vadd.f32 %v1353_v39, %v410_v35  ;;  %v437_v47 = vadd.f32 %v1350_v32, %v409_v54  ;;  %v384_v38 = vmul.f32 %v890_v55, %v1293_v51  ;;  %v383_v37 = vmul.f32 %v890_v55, %v1290_v50 }
 0x190   : > { %v432_v59 = vadd.f32 %v1353_v39, %v404_v56  ;;  %v431_v60 = vadd.f32 %v1350_v32, %v403_v57  ;;  %v378_v63 = vmul.f32 %v892_v58, %v1307_v62  ;;  %v377_v2 = vmul.f32 %v892_v58, %v1304_v61 }
 0x191   : > { %561 = vmatprep.mubr.f32.mxu1 %v438_v48  ;;  %v412_v3 = vmul.f32 %v1348_v30, %v384_v38  ;;  %v411_v4 = vmul.f32 %v1346_v29, %v383_v37 }
 0x192   : > { %v894_v5 = vpop.eup %893  ;;  %546 = vmatprep.mubr.f32.mxu0 %v432_v59  ;;  %562 = vmatmul.mubr.f32.vlgmr.msra.gmra.mxu1 %v437_v47  ;;  %v406_v51 = vmul.f32 %v1348_v30, %v378_v63  ;;  %v405_v50 = vmul.f32 %v1346_v29, %v377_v2 }
 0x193   : > { %v896_v6 = vpop.eup %895  ;;  %547 = vmatmul.mubr.f32.gmra.mxu0 %v431_v60  ;;  %v440_v7 = vadd.f32 %v1353_v39, %v412_v3  ;;  %v439_v62 = vadd.f32 %v1350_v32, %v411_v4  ;;  %v386_v61 = vmul.f32 %v894_v5, %v1313_v1  ;;  %v385_v8 = vmul.f32 %v894_v5, %v1310_v0 }
 0x194   : > { %v434_v9 = vadd.f32 %v1353_v39, %v406_v51  ;;  %v433_v10 = vadd.f32 %v1350_v32, %v405_v50  ;;  %v380_v13 = vmul.f32 %v896_v6, %v1327_v12  ;;  %v379_v16 = vmul.f32 %v896_v6, %v1324_v11 }
 0x195   : > { %566 = vmatprep.mubr.f32.mxu1 %v440_v7  ;;  %v414_v17 = vmul.f32 %v1348_v30, %v386_v61  ;;  %v413_v18 = vmul.f32 %v1346_v29, %v385_v8 }
 0x196   : > { %v898_v19 = vpop.eup %897  ;;  %551 = vmatprep.mubr.f32.mxu0 %v434_v9  ;;  %567 = vmatmul.mubr.f32.gmra.mxu1 %v439_v62  ;;  %v408_v1 = vmul.f32 %v1348_v30, %v380_v13  ;;  %v407_v0 = vmul.f32 %v1346_v29, %v379_v16 }
 0x197   : > { %552 = vmatmul.mubr.f32.gmra.mxu0 %v433_v10  ;;  %v442_v22 = vadd.f32 %v1353_v39, %v414_v17  ;;  %v441_v12 = vadd.f32 %v1350_v32, %v413_v18  ;;  %v388_v11 = vmul.f32 %v898_v19, %v1333_v15  ;;  %v387_v20 = vmul.f32 %v898_v19, %v1330_v14 }
 0x198   : > { %v436_v23 = vadd.f32 %v1353_v39, %v408_v1  ;;  %v435_v21 = vadd.f32 %v1350_v32, %v407_v0 }
 0x199   : > { %571 = vmatprep.mubr.f32.mxu1 %v442_v22  ;;  %v416_v24 = vmul.f32 %v1348_v30, %v388_v11  ;;  %v415_v25 = vmul.f32 %v1346_v29, %v387_v20 }
 0x19a   : > { %556 = vmatprep.mubr.f32.mxu0 %v436_v23  ;;  %572 = vmatmul.mubr.f32.gmra.mxu1 %v441_v12 }
 0x19b   : > { %557 = vmatmul.mubr.f32.gmra.mxu0 %v435_v21  ;;  %v444_v26 = vadd.f32 %v1353_v39, %v416_v24  ;;  %v443_v27 = vadd.f32 %v1350_v32, %v415_v25 }
 0x19d   : > { %576 = vmatprep.mubr.f32.mxu1 %v444_v26 }
 0x19e   : > { %577 = vmatmul.mubr.f32.gmra.mxu1 %v443_v27 }
 0x24e   : > { %v756_v14 = vpop.f32.mrf.mxu0 }
 0x250   : > { %v757_v15 = vpop.f32.mrf.mxu0 }
 0x251   : > { %v758_v28 = vadd.f32 %v757_v15, %v756_v14 }
 0x252   : > { %v768_v31 = vpop.f32.mrf.mxu1 }
 0x253   : > { %582 = vst [vmem:[%s1403_s20] sm:$0xff] %v758_v28  ;;  %v759_v29 = vpop.f32.mrf.mxu0 }
 0x254   : > { %v769_v30 = vpop.f32.mrf.mxu1 }
 0x255   : > { %v760_v33 = vpop.f32.mrf.mxu0  ;;  %v770_v32 = vadd.f32 %v769_v30, %v768_v31 }
 0x256   : > { %v761_v34 = vadd.f32 %v760_v33, %v759_v29  ;;  %v771_v39 = vpop.f32.mrf.mxu1 }
 0x257   : > { %586 = vst [vmem:[%s1403_s20 + $0x20] sm:$0xff] %v770_v32  ;;  %v762_v40 = vpop.f32.mrf.mxu0 }
 0x258   : > { %583 = vst [vmem:[%s1403_s20 + $0x8] sm:$0xff] %v761_v34  ;;  %v772_v41 = vpop.f32.mrf.mxu1 }
 0x259   : > { %v763_v42 = vpop.f32.mrf.mxu0  ;;  %v773_v43 = vadd.f32 %v772_v41, %v771_v39 }
 0x25a   : > { %v764_v44 = vadd.f32 %v763_v42, %v762_v40  ;;  %v774_v45 = vpop.f32.mrf.mxu1 }
 0x25b   : > { %587 = vst [vmem:[%s1403_s20 + $0x28] sm:$0xff] %v773_v43  ;;  %v765_v46 = vpop.f32.mrf.mxu0 }
 0x25c   : > { %584 = vst [vmem:[%s1403_s20 + $0x10] sm:$0xff] %v764_v44  ;;  %v775_v49 = vpop.f32.mrf.mxu1 }
 0x25d   : > { %v766_v52 = vpop.f32.mrf.mxu0  ;;  %v776_v36 = vadd.f32 %v775_v49, %v774_v45 }
 0x25e   : > { %v767_v53 = vadd.f32 %v766_v52, %v765_v46  ;;  %v777_v35 = vpop.f32.mrf.mxu1 }
 0x25f   : > { %588 = vst [vmem:[%s1403_s20 + $0x30] sm:$0xff] %v776_v36 }
 0x260   : > { %585 = vst [vmem:[%s1403_s20 + $0x18] sm:$0xff] %v767_v53  ;;  %v778_v54 = vpop.f32.mrf.mxu1 }
 0x261   : > { %v779_v55 = vadd.f32 %v778_v54, %v777_v35 }
 0x263   : > { %589 = vst [vmem:[%s1403_s20 + $0x38] sm:$0xff] %v779_v55 }
 0x264   : > { %992 = shalt.err (!%p989_p12)
}
 0x265   : > { %s993_s12 = scalar_lea.hbm %s1419_s5, 1024  ;;  %s997_s25 = scalar_lea.hbm %s1467_s4, 2048 }
 0x266   : > { %p994_p6 = scmp.ne.s32.totalorder %s1419_s5, %s993_s12  ;;  %p998_p13 = scmp.lt.s32.totalorder %s1419_s5, %s1467_s4 }
 0x267   : > { %p999_p8 = scmp.lt.s32.totalorder %s997_s25, %s993_s12 }
 0x268   : > { %p995_p7 = pnand %p994_p6, %p1486_p0 }
 0x269   : > { %p1000_p3 = por %p999_p8, %p998_p13 }
 0x26a   : > { %p996_p11 = pneg %p995_p7 }
 0x26c   : > { %p1001_p2 = pnand %p1000_p3, %p996_p11 }
 0x26e   : > { %1004 = shalt.err (!%p1001_p2)
}
 0x26f   : > { %s1055_s7 = smov 128   ;;  %s1056_s20 = smov 8  }
 0x270   : > { %822 = dma.vmem_to_hbm [thread:$0]  (%p1486_p0), %s1412_s22, 1024, %s1419_s5, %s591_s8, %s1055_s7, %s1055_s7, %s1056_s20  }
 0x271 PF: > { %s619_s11 = sand.u32 1, %s1035_s15   ;;  %p1487_p4 = scmp.ne.s32.totalorder %s1476_s28, 0 }
 0x272   : > { %p1488_p5 = scmp.ge.s32.totalorder %s1047_s18, 2  ;;  %s620_s14 = scalar_lea.sflag [#allocation4], %s619_s11 }
 0x274   : > { %p836_p9 = pnand %p1488_p5, %p1487_p4 }
 0x276   : > { %p837_p10 = pneg %p836_p9 }
 0x278   : > { %1030 = dma.done.wait (%p837_p10), %s620_s14, 1024  }
 0x279   : > { %1032 = vsyncadd (%p837_p10), %s620_s14, 4294966272  ;;  %p18_p1 = scmp.ge.s32.totalorder %s1107_s21, 4   ;;  %s1489_s15 = smov %s1039_s16 }
 0x27a   : > { %s1490_s16 = smov %s1043_s17  ;;  %s1491_s17 = smov %s1119_s24 }
 0x27b   : > { %s1492_s18 = smov %s1107_s21  ;;  %20 = sbr.rel (!%p18_p1) target bundleno = 8 (0x8), region = 90 }
 0x280   :  { %625 = vsyncpa [#allocation3], 1 }
 0x281   :  { %627 = vsyncpa [#allocation3 + $0x1], 1 }
 0x282   :  { %628 = vsyncpa [#allocation6], 1 }
 0x283   :  { %629 = vsyncpa [#allocation4], 1 }
 0x284   :  { %631 = vsyncpa [#allocation4 + $0x1], 1 }

</bundles_post_ra>
